<compile_context>
chip_gen: v7x
topology: tpu7x:2x2x1
jax: 0.10.0
libtpu: 0.0.40
codegen_flags: <defaults>
</compile_context>

<pallas_src>
import functools

import jax
import jax.numpy as jnp
from jax.experimental import pallas as pl
from jax.experimental.pallas import tpu as pltpu


def _round_up(x: int, m: int) -> int:
    return ((x + m - 1) // m) * m


def _cdiv(a: int, b: int) -> int:
    return (a + b - 1) // b


def _vmem_capacity_bytes() -> int:
    try:
        return int(pltpu.get_tpu_info().vmem_capacity_bytes)
    except Exception:
        return 64 * 2 ** 20  # conservative: v7x per-TensorCore VMEM


def _device_kind() -> str:
    try:
        return jax.devices()[0].device_kind.lower()
    except Exception:
        return ""


# --------------------------------------------------------------------------- #
# Kernels
# --------------------------------------------------------------------------- #
def _head_kernel_resident(x_ref, w1_ref, b1_ref, w2_ref, b2_ref, o_ref, *,
                          act_dtype):
    """Fully weight-resident path: one batch tile per grid step."""
    x = x_ref[...].astype(w1_ref.dtype)                       # cast in-kernel
    h = jnp.dot(x, w1_ref[...], preferred_element_type=jnp.float32)
    h = jnp.tanh((h + b1_ref[...]).astype(act_dtype))         # f32 bias, tanh in act_dtype
    out = jnp.dot(h.astype(w2_ref.dtype), w2_ref[...],
                  preferred_element_type=jnp.float32)
    o_ref[...] = (out + b2_ref[...]).astype(o_ref.dtype)


def _head_kernel_ktiled(x_ref, w1_ref, b1_ref, w2_ref, b2_ref, o_ref, acc_ref, *,
                        act_dtype):
    """K-tiled path for large H: accumulate x @ W1 over K slices, finish on last."""
    k = pl.program_id(1)

    @pl.when(k == 0)
    def _():
        acc_ref[...] = jnp.zeros_like(acc_ref)

    x = x_ref[...].astype(w1_ref.dtype)
    acc_ref[...] += jnp.dot(x, w1_ref[...], preferred_element_type=jnp.float32)

    @pl.when(k == pl.num_programs(1) - 1)
    def _():
        h = jnp.tanh((acc_ref[...] + b1_ref[...]).astype(act_dtype))
        out = jnp.dot(h.astype(w2_ref.dtype), w2_ref[...],
                      preferred_element_type=jnp.float32)
        o_ref[...] = (out + b2_ref[...]).astype(o_ref.dtype)


# --------------------------------------------------------------------------- #
# Wrapper
# --------------------------------------------------------------------------- #
def prepare_params(w1, b1, w2, b2, compute_dtype=jnp.bfloat16):
    """Pad weights to lane-aligned shapes and cast to the MXU dtype ONCE.

    Reuse the returned dict across calls; re-padding W1 every call costs
    ~6*H^2 bytes of HBM traffic for nothing.
    Weight layout: w1 [H, H], w2 [H, L] (transposed vs. nn.Linear's [out, in]).
    """
    H = w1.shape[0]
    L = w2.shape[1]
    H_pad = max(_round_up(H, 128), 128)
    L_pad = max(_round_up(L, 128), 128)

    def _pad2(a, shape, dtype):
        a = a.astype(dtype)
        if a.shape == shape:
            return a
        return jnp.zeros(shape, dtype).at[: a.shape[0], : a.shape[1]].set(a)

    return dict(
        w1=_pad2(w1, (H_pad, H_pad), compute_dtype),
        b1=_pad2(b1.reshape(1, -1), (1, H_pad), jnp.float32),
        w2=_pad2(w2, (H_pad, L_pad), compute_dtype),
        b2=_pad2(b2.reshape(1, -1), (1, L_pad), jnp.float32),
        H=H, L=L, H_pad=H_pad, L_pad=L_pad,
        compute_dtype=jnp.dtype(compute_dtype),
    )


def classification_head(x, params, *, block_m=None, force_k_tiled=False):
    """Fused (dense -> tanh -> out_proj) head.  x: [B, H] -> [B, num_labels].

    Dropout (p=0.1) is identity in eval/inference mode.
    # TODO(synk): training-mode dropout (pltpu.prng_random_bits mask) not emitted.
    """
    B, H = x.shape
    assert H == params["H"], "hidden size mismatch with prepared params"
    H_pad, L_pad, L = params["H_pad"], params["L_pad"], params["L"]
    compute_dtype = params["compute_dtype"]
    w1_p, b1_p, w2_p, b2_p = params["w1"], params["b1"], params["w2"], params["b2"]
    out_dtype = x.dtype

    # tanh/bias-add activation dtype: bf16 on v6e/v7x (bf16 VPU/EUP), f32 on v5e
    # and for the exact f32 path.
    kind = _device_kind()
    bf16_vpu = ("v6" in kind) or ("v7" in kind)
    act_dtype = (compute_dtype
                 if (bf16_vpu and compute_dtype == jnp.dtype(jnp.bfloat16))
                 else jnp.float32)

    # Only materialize a padded x copy when H is not lane-aligned (768/1024/4096
    # etc. skip it entirely).  When we must copy anyway, also round the batch up
    # to 16 rows so every block is fully in-bounds.
    if H_pad == H:
        x_in = x                      # raw activations, cast in-kernel
    else:
        b_rows = _round_up(B, 16)
        x_in = jnp.zeros((b_rows, H_pad), compute_dtype).at[:B, :H].set(
            x.astype(compute_dtype))
    B_eff = x_in.shape[0]

    xb = jnp.dtype(x_in.dtype).itemsize
    cb = jnp.dtype(compute_dtype).itemsize
    ob = jnp.dtype(out_dtype).itemsize

    vmem_cap = _vmem_capacity_bytes()
    budget = int(0.85 * vmem_cap)     # generation-aware VMEM ceiling
    if block_m is None:
        # 128 MiB VMEM chips (v5e/v6e) can afford bigger batch tiles than v7x.
        block_m = 1024 if vmem_cap >= 96 * 2 ** 20 else 512

    # Even batch tiles, 16-row aligned (bf16 MXU M-packing), never bigger than
    # the (row-aligned) batch itself.
    row_align = 8 if xb >= 4 else 16
    n_tiles = max(1, _cdiv(B_eff, block_m))
    TM = min(_round_up(_cdiv(B_eff, n_tiles), 16), _round_up(B_eff, row_align))

    weight_bytes = (H_pad * H_pad + H_pad * L_pad) * cb + (H_pad + L_pad) * 4

    def _est_resident(tm):
        return (2 * tm * H_pad * xb          # double-buffered x tiles
                + 2 * tm * L_pad * ob        # double-buffered output tiles
                + weight_bytes               # single-buffered W1/W2/b1/b2
                + tm * H_pad * (4 + 2 * cb)  # f32 dot result + bf16 x / h copies
                + tm * L_pad * 4)            # second-dot f32 accumulator

    def _est_ktiled(tm, tk):
        return (2 * tm * tk * xb             # double-buffered x K-slices
                + 2 * tm * L_pad * ob
                + 2 * tk * H_pad * cb        # double-buffered W1 K-slices
                + H_pad * L_pad * cb + (H_pad + L_pad) * 4
                + tm * H_pad * (4 + cb)      # f32 acc scratch + h copy
                + tm * tk * cb + tm * L_pad * 4)

    # Resident-weight scheme only while W1+W2 stay well inside VMEM; otherwise
    # (large H on v7x's 64 MiB) fall back to K-tiling.
    use_ktiled = force_k_tiled or (weight_bytes > budget // 2)

    cost = pl.CostEstimate(
        flops=2 * B * (H * H + H * L),
        transcendentals=B * H,
        bytes_accessed=(B * H * xb + (H * H + H * L) * cb
                        + (H + L) * 4 + B * L * ob),
    )

    if not use_ktiled:
        while _est_resident(TM) > budget and TM > 16:
            TM = max(16, _round_up(TM // 2, 16))
        grid_m = _cdiv(B_eff, TM)
        # Megacore batch-sharding only helps when activation traffic dominates;
        # in the weight-DMA-bound regime it would duplicate W1/W2 reads per core.
        batch_sem = ("parallel"
                     if (grid_m > 1 and B_eff * H_pad * xb >= weight_bytes)
                     else "arbitrary")
        kernel = functools.partial(_head_kernel_resident, act_dtype=act_dtype)
        out = pl.pallas_call(
            kernel,
            out_shape=jax.ShapeDtypeStruct((B_eff, L_pad), out_dtype),
            grid=(grid_m,),
            in_specs=[
                pl.BlockSpec((TM, H_pad), lambda i: (i, 0)),           # x: streamed
                pl.BlockSpec((H_pad, H_pad), lambda i: (0, 0),
                             pipeline_mode=pl.Buffered(1)),            # W1 resident
                pl.BlockSpec((1, H_pad), lambda i: (0, 0),
                             pipeline_mode=pl.Buffered(1)),            # b1 resident
                pl.BlockSpec((H_pad, L_pad), lambda i: (0, 0),
                             pipeline_mode=pl.Buffered(1)),            # W2 resident
                pl.BlockSpec((1, L_pad), lambda i: (0, 0),
                             pipeline_mode=pl.Buffered(1)),            # b2 resident
            ],
            out_specs=pl.BlockSpec((TM, L_pad), lambda i: (i, 0)),
            compiler_params=pltpu.CompilerParams(
                dimension_semantics=(batch_sem,),
                vmem_limit_bytes=budget,
            ),
            cost_estimate=cost,
        )(x_in, w1_p, b1_p, w2_p, b2_p)
    else:
        TK = next(t for t in (512, 256, 128) if H_pad % t == 0)
        while _est_ktiled(TM, TK) > budget and TM > 16:
            TM = max(16, _round_up(TM // 2, 16))
        grid_m = _cdiv(B_eff, TM)
        grid_k = H_pad // TK
        batch_sem = ("parallel"
                     if (grid_m > 1 and B_eff * H_pad * xb >= weight_bytes)
                     else "arbitrary")
        kernel = functools.partial(_head_kernel_ktiled, act_dtype=act_dtype)
        out = pl.pallas_call(
            kernel,
            out_shape=jax.ShapeDtypeStruct((B_eff, L_pad), out_dtype),
            grid=(grid_m, grid_k),
            in_specs=[
                pl.BlockSpec((TM, TK), lambda i, k: (i, k)),           # x K-slices
                pl.BlockSpec((TK, H_pad), lambda i, k: (k, 0)),        # W1 K-slices (dbl buf)
                pl.BlockSpec((1, H_pad), lambda i, k: (0, 0),
                             pipeline_mode=pl.Buffered(1)),            # b1 resident
                pl.BlockSpec((H_pad, L_pad), lambda i, k: (0, 0),
                             pipeline_mode=pl.Buffered(1)),            # W2 resident
                pl.BlockSpec((1, L_pad), lambda i, k: (0, 0),
                             pipeline_mode=pl.Buffered(1)),            # b2 resident
            ],
            out_specs=pl.BlockSpec((TM, L_pad), lambda i, k: (i, 0)),
            scratch_shapes=[pltpu.VMEM((TM, H_pad), jnp.float32)],     # f32 acc
            compiler_params=pltpu.CompilerParams(
                dimension_semantics=(batch_sem, "arbitrary"),
                vmem_limit_bytes=budget,
            ),
            cost_estimate=cost,
        )(x_in, w1_p, b1_p, w2_p, b2_p)

    return out[:B, :L]


def _reference(x, w1, b1, w2, b2):
    h = jnp.tanh(x @ w1 + b1)
    return h @ w2 + b2


if __name__ == "__main__":
    B, H, L = 8, 32, 4  # batch, hidden_size, num_labels

    key = jax.random.PRNGKey(0)
    kx, kw1, kb1, kw2, kb2 = jax.random.split(key, 5)

    bound = 1.0 / (H ** 0.5)
    x = jax.random.normal(kx, (B, H), dtype=jnp.float32)
    w1 = jax.random.uniform(kw1, (H, H), minval=-bound, maxval=bound,
                            dtype=jnp.float32)
    b1 = jax.random.uniform(kb1, (H,), minval=-bound, maxval=bound,
                            dtype=jnp.float32)
    w2 = jax.random.uniform(kw2, (H, L), minval=-bound, maxval=bound,
                            dtype=jnp.float32)
    b2 = jax.random.uniform(kb2, (L,), minval=-bound, maxval=bound,
                            dtype=jnp.float32)

    ref = _reference(x, w1, b1, w2, b2)

    # Performance path: bf16 MXU inputs, f32 accumulation; weights prepared once.
    params_bf16 = prepare_params(w1, b1, w2, b2, compute_dtype=jnp.bfloat16)
    out_bf16 = jax.block_until_ready(classification_head(x, params_bf16))
    assert out_bf16.shape == (B, L)
    assert jnp.allclose(out_bf16, ref, atol=3e-2, rtol=3e-2), \
        "bf16 kernel mismatch vs reference"

    # Exactness path: f32 end-to-end matches the reference tightly.
    params_f32 = prepare_params(w1, b1, w2, b2, compute_dtype=jnp.float32)
    out_f32 = jax.block_until_ready(classification_head(x, params_f32))
    assert out_f32.shape == (B, L)
    assert jnp.allclose(out_f32, ref, atol=1e-4, rtol=1e-4), \
        "f32 kernel mismatch vs reference"

    # K-tiled fallback (used automatically for large H on v7x); force it here to
    # verify the second code path compiles and is numerically correct.
    out_kt = jax.block_until_ready(
        classification_head(x, params_f32, force_k_tiled=True))
    assert out_kt.shape == (B, L)
    assert jnp.allclose(out_kt, ref, atol=1e-4, rtol=1e-4), \
        "k-tiled kernel mismatch vs reference"

    print("KERNEL_OK")
</pallas_src>

<mosaic_0001>
module attributes {stable_mosaic.version = 11 : i64} {
  func.func @_head_kernel_resident(%arg0: i32, %arg1: memref<16x128xbf16, #tpu.memory_space<vmem>>, %arg2: memref<128x128xbf16, #tpu.memory_space<vmem>>, %arg3: memref<1x128xf32, #tpu.memory_space<vmem>>, %arg4: memref<128x128xbf16, #tpu.memory_space<vmem>>, %arg5: memref<1x128xf32, #tpu.memory_space<vmem>>, %arg6: memref<16x128xf32, #tpu.memory_space<vmem>>) attributes {dimension_semantics = [#tpu.dimension_semantics<arbitrary>], iteration_bounds = array<i64: 1>, scalar_prefetch = 0 : i64, scratch_operands = 0 : i64, tpu.core_type = #tpu.core_type<tc>, window_params = [{transform_indices = @transform_0, window_bounds = array<i64: 16, 128>}, {pipeline_mode = #tpu.pipeline_mode<synchronous>, transform_indices = @transform_1, window_bounds = array<i64: 128, 128>}, {pipeline_mode = #tpu.pipeline_mode<synchronous>, transform_indices = @transform_2, window_bounds = array<i64: 1, 128>}, {pipeline_mode = #tpu.pipeline_mode<synchronous>, transform_indices = @transform_3, window_bounds = array<i64: 128, 128>}, {pipeline_mode = #tpu.pipeline_mode<synchronous>, transform_indices = @transform_4, window_bounds = array<i64: 1, 128>}, {transform_indices = @transform_5, window_bounds = array<i64: 16, 128>}]} {
    %c0 = arith.constant 0 : index
    %c0_0 = arith.constant 0 : index
    %0 = vector.load %arg1[%c0, %c0_0] : memref<16x128xbf16, #tpu.memory_space<vmem>>, vector<16x128xbf16>
    %c0_1 = arith.constant 0 : index
    %c0_2 = arith.constant 0 : index
    %1 = vector.load %arg2[%c0_1, %c0_2] : memref<128x128xbf16, #tpu.memory_space<vmem>>, vector<128x128xbf16>
    %cst = arith.constant dense<0.000000e+00> : vector<16x128xf32>
    %2 = tpu.matmul %0, %1, %cst {dimension_numbers = #tpu.dot_dimension_numbers<[1], [0], [0], [1], [0, 0, 1, 1], [], []>} : vector<16x128xbf16>, vector<128x128xbf16>, vector<16x128xf32> -> vector<16x128xf32>
    %c0_3 = arith.constant 0 : index
    %c0_4 = arith.constant 0 : index
    %3 = vector.load %arg3[%c0_3, %c0_4] : memref<1x128xf32, #tpu.memory_space<vmem>>, vector<1x128xf32>
    %4 = vector.broadcast %3 : vector<1x128xf32> to vector<16x128xf32>
    %5 = arith.addf %2, %4 : vector<16x128xf32>
    %6 = math.tanh %5 : vector<16x128xf32>
    %7 = arith.truncf %6 : vector<16x128xf32> to vector<16x128xbf16>
    %c0_5 = arith.constant 0 : index
    %c0_6 = arith.constant 0 : index
    %8 = vector.load %arg4[%c0_5, %c0_6] : memref<128x128xbf16, #tpu.memory_space<vmem>>, vector<128x128xbf16>
    %cst_7 = arith.constant dense<0.000000e+00> : vector<16x128xf32>
    %9 = tpu.matmul %7, %8, %cst_7 {dimension_numbers = #tpu.dot_dimension_numbers<[1], [0], [0], [1], [0, 0, 1, 1], [], []>} : vector<16x128xbf16>, vector<128x128xbf16>, vector<16x128xf32> -> vector<16x128xf32>
    %c0_8 = arith.constant 0 : index
    %c0_9 = arith.constant 0 : index
    %10 = vector.load %arg5[%c0_8, %c0_9] : memref<1x128xf32, #tpu.memory_space<vmem>>, vector<1x128xf32>
    %11 = vector.broadcast %10 : vector<1x128xf32> to vector<16x128xf32>
    %12 = arith.addf %9, %11 : vector<16x128xf32>
    %c0_10 = arith.constant 0 : index
    %c0_11 = arith.constant 0 : index
    %13 = vector.load %arg6[%c0_10, %c0_11] : memref<16x128xf32, #tpu.memory_space<vmem>>, vector<16x128xf32>
    tpu.vector_store %arg6[%c0_10, %c0_11], %12 {strides = array<i32>} : memref<16x128xf32, #tpu.memory_space<vmem>>, vector<16x128xf32>,
    return
  }
  func.func @transform_0(%arg0: i32) -> (i32, i32) {
    %c0_i32 = arith.constant 0 : i32
    %c0_i32_0 = arith.constant 0 : i32
    return %arg0, %c0_i32 : i32, i32
  }
  func.func @transform_1(%arg0: i32) -> (i32, i32) {
    %c0_i32 = arith.constant 0 : i32
    %c0_i32_0 = arith.constant 0 : i32
    %c0_i32_1 = arith.constant 0 : i32
    return %c0_i32, %c0_i32_0 : i32, i32
  }
  func.func @transform_2(%arg0: i32) -> (i32, i32) {
    %c0_i32 = arith.constant 0 : i32
    %c0_i32_0 = arith.constant 0 : i32
    %c0_i32_1 = arith.constant 0 : i32
    return %c0_i32, %c0_i32_0 : i32, i32
  }
  func.func @transform_3(%arg0: i32) -> (i32, i32) {
    %c0_i32 = arith.constant 0 : i32
    %c0_i32_0 = arith.constant 0 : i32
    %c0_i32_1 = arith.constant 0 : i32
    return %c0_i32, %c0_i32_0 : i32, i32
  }
  func.func @transform_4(%arg0: i32) -> (i32, i32) {
    %c0_i32 = arith.constant 0 : i32
    %c0_i32_0 = arith.constant 0 : i32
    %c0_i32_1 = arith.constant 0 : i32
    return %c0_i32, %c0_i32_0 : i32, i32
  }
  func.func @transform_5(%arg0: i32) -> (i32, i32) {
    %c0_i32 = arith.constant 0 : i32
    %c0_i32_0 = arith.constant 0 : i32
    return %arg0, %c0_i32 : i32, i32
  }
}

</mosaic_0001>

<bundles_post_ra>
// kernel: tpu_custom_call.1
= control target key start
LH: loop header
LB: loop body
LE: loop exit
PB: predicated region body
PF: predicated region fallthrough
CT: control target
= control target key end

     0   :  { %10 = vsyncpa [#allocation3], 0  ;;  %s630_s0 = inlined_call_operand.hbm [shape: bf16[16,128], index: 0, kind: input, shape index: {}]   ;;  %s631_s1 = inlined_call_operand.hbm [shape: bf16[128,128], index: 1, kind: input, shape index: {}]   ;;  %s632_s2 = inlined_call_operand.vmem [shape: f32[1,128], index: 2, kind: input, shape index: {}]   ;;  %s633_s3 = inlined_call_operand.hbm [shape: bf16[128,128], index: 3, kind: input, shape index: {}]   ;;  %s634_s4 = inlined_call_operand.vmem [shape: f32[1,128], index: 4, kind: input, shape index: {}]   ;;  %s635_s5 = inlined_call_operand.hbm [shape: f32[16,128], index: 5, kind: output, shape index: {}]  }
   0x1   :  { %11 = vsyncpa [#allocation6], 0 }
   0x2   :  { %12 = vsyncpa [#allocation4], 0  ;;  %s520_s18 = smov [#allocation5]   ;;  %s521_s20 = smov [#allocation2]  }
   0x3   :  { %s30_s19 = sshll.u32 %s520_s18, 4  ;;  %s18_s21 = sshll.u32 %s521_s20, 4  ;;  %s31_s19 = int_to_ptr.vmem [resolvable:$true] %s30_s19  ;;  %s560_s21 = int_to_ptr.vmem [resolvable:$true] %s18_s21 }
   0x4   :  { %s426_s24 = scalar_lea.hbm %s631_s1, 1024 }
   0x5   :  { %p427_p0 = scmp.ne.s32.totalorder %s631_s1, %s426_s24  ;;  %p430_p1 = scmp.lt.u32.totalorder %s426_s24, %s631_s1 }
   0x7   :  { %p432_p2 = pnand %p430_p1, %p427_p0 }
   0x9   :  { %435 = shalt.err (!%p432_p2)
}
   0xa   :  { %s436_s29 = scalar_lea.vmem %s31_s19, 1024  ;;  %p441_p4 = scmp.lt.s32.totalorder %s31_s19, %s31_s19 }
   0xb   :  { %p437_p3 = scmp.ne.s32.totalorder %s31_s19, %s436_s29  ;;  %p442_p5 = scmp.lt.s32.totalorder %s436_s29, %s436_s29 }
   0xd   :  { %p443_p6 = por %p442_p5, %p441_p4 }
   0xf   :  { %p444_p7 = pnand %p443_p6, %p437_p3 }
  0x11   :  { %447 = shalt.err (!%p444_p7)
}
  0x12   :  { %s522_s30 = smov 64   ;;  %s523_s6 = smov 4  }
  0x13   :  { %36 = dma.hbm_to_vmem [thread:$0]  %s631_s1, 1024, %s31_s19, [#allocation6], %s522_s30, %s522_s30, %s523_s6  }
  0x14   :  { %s448_s11 = scalar_lea.hbm %s630_s0, 128 }
  0x15   :  { %p449_p8 = scmp.ne.s32.totalorder %s630_s0, %s448_s11  ;;  %p452_p9 = scmp.lt.u32.totalorder %s448_s11, %s630_s0 }
  0x17   :  { %p454_p10 = pnand %p452_p9, %p449_p8 }
  0x19   :  { %457 = shalt.err (!%p454_p10)
}
  0x1a   :  { %s458_s16 = scalar_lea.vmem %s560_s21, 128  ;;  %p463_p12 = scmp.lt.s32.totalorder %s560_s21, %s560_s21 }
  0x1b   :  { %p459_p11 = scmp.ne.s32.totalorder %s560_s21, %s458_s16  ;;  %p464_p13 = scmp.lt.s32.totalorder %s458_s16, %s458_s16 }
  0x1d   :  { %p465_p0 = por %p464_p13, %p463_p12 }
  0x1f   :  { %p466_p1 = pnand %p465_p0, %p459_p11 }
  0x21   :  { %469 = shalt.err (!%p466_p1)
}
  0x22   :  { %24 = dma.hbm_to_vmem [thread:$0]  %s630_s0, 128, %s560_s21, [#allocation3], %s522_s30, %s522_s30, %s523_s6  }
  0x23   :  { %s524_s18 = smov [#allocation7]   ;;  %s470_s23 = scalar_lea.hbm %s633_s3, 1024 }
  0x24   :  { %s44_s19 = sshll.u32 %s524_s18, 4  ;;  %p471_p2 = scmp.ne.s32.totalorder %s633_s3, %s470_s23  ;;  %s45_s19 = int_to_ptr.vmem [resolvable:$true] %s44_s19 }
  0x25   :  { %p474_p3 = scmp.lt.u32.totalorder %s470_s23, %s633_s3 }
  0x27   :  { %p476_p4 = pnand %p474_p3, %p471_p2 }
  0x29   :  { %479 = shalt.err (!%p476_p4)
}
  0x2a   :  { %s480_s28 = scalar_lea.vmem %s45_s19, 1024  ;;  %p485_p6 = scmp.lt.s32.totalorder %s45_s19, %s45_s19 }
  0x2b   :  { %p481_p5 = scmp.ne.s32.totalorder %s45_s19, %s480_s28  ;;  %p486_p7 = scmp.lt.s32.totalorder %s480_s28, %s480_s28 }
  0x2d   :  { %p487_p8 = por %p486_p7, %p485_p6 }
  0x2f   :  { %p488_p9 = pnand %p487_p8, %p481_p5 }
  0x31   :  { %491 = shalt.err (!%p488_p9)
}
  0x32   :  { %50 = dma.hbm_to_vmem [thread:$0]  %s633_s3, 1024, %s45_s19, [#allocation6], %s522_s30, %s522_s30, %s523_s6  }
  0x33   :  { %514 = dma.done.wait [#allocation3], 128  }
  0x34   :  { %515 = vsyncadd [#allocation3], 4294967168 }
  0x35   :  { %516 = dma.done.wait [#allocation6], 2048  }
  0x36   :  { %517 = vsyncadd [#allocation6], 4294965248  ;;  %v525_v0 = vmov 0.0   ;;  %vm526_vm0 = vmmov 0   ;;  %v405_v1 = vld [vmem:[#allocation5] sm:$0xff]   ;;  %v406_v2 = vld [vmem:[#allocation5 + $0x8] sm:$0xff]  }
  0x37   :  { %355 = vmatprep.subr.bf16.mxu0 %v525_v0  ;;  %371 = vmatprep.mubr.msk.bf16.mxu0 %vm526_vm0, %v525_v0  ;;  %v407_v3 = vld [vmem:[#allocation5 + $0x10] sm:$0xff]   ;;  %v414_v4 = vld [vmem:[#allocation7] sm:$0xff]   ;;  %v408_v5 = vld [vmem:[#allocation5 + $0x18] sm:$0xff]   ;;  %s527_s7 = smov [#allocation8]  }
  0x38   :  { %375 = vmatprep.subr.bf16.mxu1 %v525_v0  ;;  %391 = vmatprep.mubr.msk.bf16.mxu1 %vm526_vm0, %v525_v0  ;;  %v415_v6 = vld [vmem:[#allocation7 + $0x8] sm:$0xff]   ;;  %v409_v7 = vld [vmem:[#allocation5 + $0x20] sm:$0xff]   ;;  %v416_v8 = vld [vmem:[#allocation7 + $0x10] sm:$0xff]   ;;  %s305_s8 = sshll.u32 %s527_s7, 4  ;;  %s306_s8 = int_to_ptr.vmem [resolvable:$true] %s305_s8 }
  0x39   :  { %356 = vmatpush3.bf16.msra.mxu0 %v405_v1  ;;  %376 = vmatpush3.bf16.msra.mxu1 %v414_v4  ;;  %v410_v9 = vld [vmem:[#allocation5 + $0x28] sm:$0xff]   ;;  %v417_v10 = vld [vmem:[#allocation7 + $0x18] sm:$0xff]   ;;  %v411_v11 = vld [vmem:[#allocation5 + $0x30] sm:$0xff]   ;;  %p497_p11 = scmp.lt.s32.totalorder %s306_s8, %s306_s8 }
  0x3a   :  { %357 = vmatprep.subr.bf16.mxu0 %v525_v0  ;;  %377 = vmatprep.subr.bf16.mxu1 %v525_v0  ;;  %v412_v12 = vld [vmem:[#allocation5 + $0x38] sm:$0xff]   ;;  %v418_v14 = vld [vmem:[#allocation7 + $0x20] sm:$0xff]   ;;  %v419_v15 = vld [vmem:[#allocation7 + $0x28] sm:$0xff]  }
  0x3b   :  { %v413_v13 = vld [vmem:[#allocation2] sm:$0xff]   ;;  %v420_v16 = vld [vmem:[#allocation7 + $0x30] sm:$0xff]  }
  0x3c   :  { %v421_v17 = vld [vmem:[#allocation7 + $0x38] sm:$0xff]  }
  0x3d   :  { %358 = vmatpush3.bf16.msra.mxu0 %v406_v2  ;;  %378 = vmatpush3.bf16.msra.mxu1 %v415_v6  ;;  %v318_v18 = vld [vmem:[%s632_s2] ss:$0 sm:$0xff]  ;;  %s492_s2 = scalar_lea.vmem %s306_s8, 256 }
  0x3e   :  { %359 = vmatprep.subr.bf16.mxu0 %v525_v0  ;;  %379 = vmatprep.subr.bf16.mxu1 %v525_v0  ;;  %v328_v28 = vld [vmem:[%s634_s4] ss:$0 sm:$0xff]  ;;  %p493_p10 = scmp.ne.s32.totalorder %s306_s8, %s492_s2  ;;  %p498_p12 = scmp.lt.s32.totalorder %s492_s2, %s492_s2 }
  0x40   :  { %p499_p13 = por %p498_p12, %p497_p11 }
  0x41   :  { %360 = vmatpush3.bf16.msra.mxu0 %v407_v3  ;;  %380 = vmatpush3.bf16.msra.mxu1 %v416_v8 }
  0x42   :  { %361 = vmatprep.subr.bf16.mxu0 %v525_v0  ;;  %381 = vmatprep.subr.bf16.mxu1 %v525_v0  ;;  %p500_p0 = pnand %p499_p13, %p493_p10 }
  0x45   :  { %362 = vmatpush3.bf16.msra.mxu0 %v408_v5  ;;  %382 = vmatpush3.bf16.msra.mxu1 %v417_v10 }
  0x46   :  { %363 = vmatprep.subr.bf16.mxu0 %v525_v0  ;;  %383 = vmatprep.subr.bf16.mxu1 %v525_v0 }
  0x49   :  { %364 = vmatpush3.bf16.msra.mxu0 %v409_v7  ;;  %384 = vmatpush3.bf16.msra.mxu1 %v418_v14 }
  0x4a   :  { %365 = vmatprep.subr.bf16.mxu0 %v525_v0  ;;  %385 = vmatprep.subr.bf16.mxu1 %v525_v0 }
  0x4d   :  { %366 = vmatpush3.bf16.msra.mxu0 %v410_v9  ;;  %386 = vmatpush3.bf16.msra.mxu1 %v419_v15 }
  0x4e   :  { %367 = vmatprep.subr.bf16.mxu0 %v525_v0  ;;  %387 = vmatprep.subr.bf16.mxu1 %v525_v0 }
  0x51   :  { %368 = vmatpush3.bf16.msra.mxu0 %v411_v11  ;;  %388 = vmatpush3.bf16.msra.mxu1 %v420_v16 }
  0x52   :  { %369 = vmatprep.subr.bf16.mxu0 %v525_v0  ;;  %389 = vmatprep.subr.bf16.mxu1 %v525_v0 }
  0x55   :  { %370 = vmatpush3.bf16.msra.mxu0 %v412_v12  ;;  %390 = vmatpush3.bf16.msra.mxu1 %v421_v17 }
  0x58   :  { %372 = vmatmul.mubr.bf16.vlgmr.msra.gmra.mrb[0].mxu0 %v413_v13 }
 0x12b   :  { %v176_v19 = vpop.f32.mrb[0].mxu0 }
 0x12c   :  { %v177_v20 = vadd.f32 %v318_v18, %v176_v19  ;;  %v373_v21 = vpop.f32.mrb[1].mxu0 }
 0x12d   :  { %v179_v22 = vpop.f32.mrb[2].mxu0 }
 0x12e   :  { %v180_v23 = vadd.f32 %v318_v18, %v179_v22  ;;  %v374_v24 = vpop.f32.mrb[3].mxu0  ;;  %422 = vtanh.f32 %v177_v20 }
 0x130   :  { %424 = vtanh.f32 %v180_v23 }
 0x138   :  { %v423_v25 = vpop.eup %422 }
 0x13a   :  { %v425_v26 = vpop.eup %424 }
 0x13b   :  { %v185_v27 = vpack.c.bf16 %v425_v26, %v423_v25 }
 0x13d   :  { %392 = vmatmul.mubr.bf16.vlgmr.msra.gmra.mrb[0].mxu1 %v185_v27 }
 0x210   :  { %v291_v29 = vpop.f32.mrb[0].mxu1 }
 0x211   :  { %v292_v30 = vadd.f32 %v328_v28, %v291_v29  ;;  %v393_v31 = vpop.f32.mrb[1].mxu1 }
 0x212   :  { %v294_v32 = vpop.f32.mrb[2].mxu1 }
 0x213   :  { %298 = vst [vmem:[#allocation8] sm:$0xff] %v292_v30  ;;  %v295_v33 = vadd.f32 %v328_v28, %v294_v32  ;;  %v394_v34 = vpop.f32.mrb[3].mxu1 }
 0x215   :  { %299 = vst [vmem:[#allocation8 + $0x8] sm:$0xff] %v295_v33 }
 0x216   :  { %503 = shalt.err (!%p500_p0)
}
 0x217   :  { %s504_s10 = scalar_lea.hbm %s635_s5, 256 }
 0x218   :  { %p505_p1 = scmp.ne.s32.totalorder %s635_s5, %s504_s10  ;;  %p508_p2 = scmp.lt.u32.totalorder %s504_s10, %s635_s5 }
 0x21a   :  { %p510_p3 = pnand %p508_p2, %p505_p1 }
 0x21c   :  { %513 = shalt.err (!%p510_p3)
}
 0x21d   :  { %s528_s15 = smov 128   ;;  %s529_s16 = smov 8  }
 0x21e   :  { %311 = dma.vmem_to_hbm [thread:$0]  %s306_s8, 256, %s635_s5, [#allocation4], %s528_s15, %s528_s15, %s529_s16  }
 0x21f   :  { %518 = dma.done.wait [#allocation4], 256  }
 0x220   :  { %519 = vsyncadd [#allocation4], 4294967040 }
 0x221   :  { %315 = vsyncpa [#allocation3], 1 }
 0x222   :  { %316 = vsyncpa [#allocation6], 1 }
 0x223   :  { %317 = vsyncpa [#allocation4], 1 }

</bundles_post_ra>
